<compile_context>
chip_gen: v7x
topology: tpu7x:2x2x1
jax: 0.10.0
libtpu: 0.0.40
codegen_flags: <defaults>
</compile_context>

<pallas_src>
import jax
import jax.numpy as jnp
from jax.experimental import pallas as pl
from jax.experimental.pallas import tpu as pltpu


def _round_up(x, m):
    return ((x + m - 1) // m) * m


def make_tcn_kernel(meta, K, TL, R):
    """Fused all-layer TCN kernel for one (batch, time-tile) grid step.

    meta[i]: dict(d=dilation, p=(K-1)*d, R_after=remaining halo after layer i,
                  cin_p / cout_p = lane-padded channel widths, has_down=bool)
    """
    nl = len(meta)
    n_wrefs = sum(6 if m['has_down'] else 4 for m in meta)
    has_halo = R > 0

    def kernel(*refs):
        idx = 0
        if has_halo:
            halo_ref = refs[idx]; idx += 1            # (R, C0p) bf16
        body_ref = refs[idx]; idx += 1                # (TL, C0p) bf16
        wrefs = refs[idx:idx + n_wrefs]; idx += n_wrefs
        o_ref = refs[idx]; idx += 1                   # (TL, CLp) bf16
        bufs = list(refs[idx:idx + 3])                # rotating bf16 VMEM bufs

        t = pl.program_id(1)
        tile_t0 = t * TL                              # absolute time of output row 0

        # Assemble this tile's input window (halo rows + body rows) in VMEM.
        c0 = meta[0]['cin_p']
        if has_halo:
            bufs[0][pl.ds(0, R), :c0] = halo_ref[...]
        bufs[0][pl.ds(R, TL), :c0] = body_ref[...]

        def mask_prefix(ref, halo, width):
            # Zero rows whose absolute time < 0 (per-layer causal left pad).
            # Only the first `halo` rows of `ref` can ever be negative-time,
            # and only when tile_t0 < halo -> gate behind pl.when.
            @pl.when(tile_t0 < halo)
            def _():
                times = (tile_t0 - halo) + jax.lax.broadcasted_iota(
                    jnp.int32, (halo, 1), 0)
                v = ref[pl.ds(0, halo), :width]
                ref[pl.ds(0, halo), :width] = jnp.where(
                    times >= 0, v, jnp.zeros_like(v))

        cur, wi = 0, 0
        for li, m in enumerate(meta):
            d, p, r_next = m['d'], m['p'], m['R_after']
            cin_p, cout_p = m['cin_p'], m['cout_p']
            has_down = m['has_down']
            in_ref = bufs[cur]               # row0 time = tile_t0 - (r_next + 2p)
            mid_ref = bufs[(cur + 1) % 3]    # row0 time = tile_t0 - (r_next + p)
            nxt_ref = bufs[(cur + 2) % 3]    # row0 time = tile_t0 - r_next
            w1, b1, w2, b2 = wrefs[wi:wi + 4]
            wi += 4
            if has_down:
                wd, bd = wrefs[wi:wi + 2]
                wi += 2

            n_mid = TL + r_next + p          # conv1 rows needed by conv2
            n_out = TL + r_next              # layer-output rows needed downstream

            # ---- causal dilated conv #1: K taps fused into one MXU matmul ----
            x1 = jnp.concatenate(
                [in_ref[pl.ds(j * d, n_mid), :cin_p] for j in range(K)], axis=-1)
            h = jnp.dot(x1, w1[...], preferred_element_type=jnp.float32)
            h = jnp.maximum(h + b1[...], 0.0)      # ReLU (dropout = identity, eval)
            mid_ref[pl.ds(0, n_mid), :cout_p] = h.astype(mid_ref.dtype)
            if r_next + p > 0:
                mask_prefix(mid_ref, r_next + p, cout_p)

            # ---- causal dilated conv #2 ----
            x2 = jnp.concatenate(
                [mid_ref[pl.ds(j * d, n_out), :cout_p] for j in range(K)], axis=-1)
            out2 = jnp.dot(x2, w2[...], preferred_element_type=jnp.float32)
            out2 = jnp.maximum(out2 + b2[...], 0.0)

            # ---- residual (+ optional 1x1 downsample) + ReLU ----
            xres = in_ref[pl.ds(2 * p, n_out), :cin_p]
            if has_down:
                res = jnp.dot(xres, wd[...],
                              preferred_element_type=jnp.float32) + bd[...]
            else:
                res = xres.astype(jnp.float32)
            y = jnp.maximum(out2 + res, 0.0)

            if li == nl - 1:
                o_ref[...] = y.astype(o_ref.dtype)   # n_out == TL for last layer
            else:
                nxt_ref[pl.ds(0, n_out), :cout_p] = y.astype(nxt_ref.dtype)
                if r_next > 0:
                    mask_prefix(nxt_ref, r_next, cout_p)
                cur = (cur + 2) % 3

    return kernel


def tcn_forward(x_bcl, params, kernel_size, time_tile=None):
    """TemporalConvNet forward. x_bcl: (B, C, L) -> (B, C_last, L) float32."""
    B, C0, L = x_bcl.shape
    K = kernel_size
    nl = len(params)
    channels = [int(p['w1'].shape[0]) for p in params]

    # Per-layer lane-dense channel padding.
    c_pad = [_round_up(c, 128) for c in [C0] + channels]
    C0p, CLp, Cmax = c_pad[0], c_pad[-1], max(c_pad)

    pads = [(K - 1) * (2 ** i) for i in range(nl)]
    R = 2 * sum(pads)                                  # total causal halo of the stack
    meta, rem = [], R
    for i in range(nl):
        rem -= 2 * pads[i]
        meta.append(dict(d=2 ** i, p=pads[i], R_after=rem,
                         cin_p=c_pad[i], cout_p=c_pad[i + 1],
                         has_down=params[i]['wd'] is not None))

    # ---- weights: per-layer padded, bf16 operands / f32 biases ----
    weight_inputs, weight_specs = [], []
    for i, prm in enumerate(params):
        cin = C0 if i == 0 else channels[i - 1]
        cout = channels[i]
        cin_p, cout_p = c_pad[i], c_pad[i + 1]
        w1 = jnp.transpose(prm['w1'], (2, 1, 0))                         # (K, cin, cout)
        w1 = jnp.pad(w1, ((0, 0), (0, cin_p - cin), (0, cout_p - cout)))
        w1 = w1.reshape(K * cin_p, cout_p).astype(jnp.bfloat16)
        b1 = jnp.pad(prm['b1'], (0, cout_p - cout)).reshape(1, cout_p).astype(jnp.float32)
        w2 = jnp.transpose(prm['w2'], (2, 1, 0))                         # (K, cout, cout)
        w2 = jnp.pad(w2, ((0, 0), (0, cout_p - cout), (0, cout_p - cout)))
        w2 = w2.reshape(K * cout_p, cout_p).astype(jnp.bfloat16)
        b2 = jnp.pad(prm['b2'], (0, cout_p - cout)).reshape(1, cout_p).astype(jnp.float32)
        weight_inputs += [w1, b1, w2, b2]
        weight_specs += [
            pl.BlockSpec((K * cin_p, cout_p), lambda b, t: (0, 0)),
            pl.BlockSpec((1, cout_p), lambda b, t: (0, 0)),
            pl.BlockSpec((K * cout_p, cout_p), lambda b, t: (0, 0)),
            pl.BlockSpec((1, cout_p), lambda b, t: (0, 0)),
        ]
        if meta[i]['has_down']:
            wd = jnp.transpose(prm['wd'][:, :, 0])                       # (cin, cout)
            wd = jnp.pad(wd, ((0, cin_p - cin), (0, cout_p - cout))).astype(jnp.bfloat16)
            bd = jnp.pad(prm['bd'], (0, cout_p - cout)).reshape(1, cout_p).astype(jnp.float32)
            weight_inputs += [wd, bd]
            weight_specs += [
                pl.BlockSpec((cin_p, cout_p), lambda b, t: (0, 0)),
                pl.BlockSpec((1, cout_p), lambda b, t: (0, 0)),
            ]
    weight_bytes = sum(int(a.size) * a.dtype.itemsize for a in weight_inputs)

    # ---- TL / VMEM plan from the actual per-core budget ----
    try:
        vmem_cap = int(pltpu.get_tpu_info().vmem_capacity_bytes)
    except Exception:
        vmem_cap = 64 * 1024 * 1024                    # conservative (v7x per-TC)

    def vmem_needed(tl):
        scratch = 3 * (tl + R) * Cmax * 2              # bf16 rotating activation bufs
        io = 2 * (tl + R) * C0p * 2 + 2 * tl * CLp * 2  # double-buffered in/out blocks
        return scratch + io + 2 * weight_bytes         # weights double-buffered (const)

    if time_tile is None:
        budget = int(vmem_cap * 0.45)
        cap = min(_round_up(L, 8), 4096)
        TL = 8
        while TL * 2 <= cap and vmem_needed(TL * 2) <= budget:
            TL *= 2
        if B == 1 and TL >= _round_up(L, 8) and L > 8:
            TL = max(8, _round_up((L + 1) // 2, 8))    # keep both v7x TCs busy
    else:
        TL = max(8, _round_up(time_tile, 8))
    Lp = _round_up(L, TL)
    nT = Lp // TL
    vmem_limit = int(min(vmem_cap, max(32 * 1024 * 1024, 2 * vmem_needed(TL))))

    # ---- activations: (B, L, C) layout, bf16, lane-padded channels ----
    x_blc = jnp.transpose(x_bcl, (0, 2, 1))
    x_blc = jnp.pad(x_blc, ((0, 0), (0, 0), (0, C0p - C0))).astype(jnp.bfloat16)
    body = jnp.pad(x_blc, ((0, 0), (0, Lp - L), (0, 0)))          # (B, Lp, C0p)

    inputs, in_specs = [], []
    if R > 0:
        padded = jnp.pad(x_blc, ((0, 0), (R, Lp - L), (0, 0)))    # (B, R+Lp, C0p)
        # halo[b, t] = the R rows immediately before tile t (zeros for time < 0)
        halo = jnp.stack([padded[:, t * TL:t * TL + R, :] for t in range(nT)],
                         axis=1)                                   # (B, nT, R, C0p)
        inputs.append(halo)
        in_specs.append(pl.BlockSpec((None, None, R, C0p),
                                     lambda b, t: (b, t, 0, 0)))
    inputs.append(body)
    in_specs.append(pl.BlockSpec((None, TL, C0p), lambda b, t: (b, t, 0)))
    inputs += weight_inputs
    in_specs += weight_specs

    kernel = make_tcn_kernel(meta, K, TL, R)

    # advisory cost estimate for XLA scheduling
    flops = 0
    for m in meta:
        per_row = 2 * K * m['cin_p'] * m['cout_p'] + 2 * K * m['cout_p'] * m['cout_p']
        if m['has_down']:
            per_row += 2 * m['cin_p'] * m['cout_p']
        flops += B * Lp * per_row
    bytes_accessed = (B * Lp * C0p * 2 + (B * nT * R * C0p * 2 if R > 0 else 0)
                      + weight_bytes + B * Lp * CLp * 2)

    out = pl.pallas_call(
        kernel,
        out_shape=jax.ShapeDtypeStruct((B, Lp, CLp), jnp.bfloat16),
        grid=(B, nT),
        in_specs=in_specs,
        out_specs=pl.BlockSpec((None, TL, CLp), lambda b, t: (b, t, 0)),
        scratch_shapes=[pltpu.VMEM((TL + R, Cmax), jnp.bfloat16) for _ in range(3)],
        compiler_params=pltpu.CompilerParams(
            dimension_semantics=("parallel", "parallel"),
            vmem_limit_bytes=vmem_limit),
        cost_estimate=pl.CostEstimate(flops=flops, transcendentals=0,
                                      bytes_accessed=bytes_accessed),
    )(*inputs)

    out = out[:, :L, :channels[-1]].astype(jnp.float32)
    return jnp.transpose(out, (0, 2, 1))


def init_tcn_params(key, num_inputs, num_channels, kernel_size):
    """Deterministic synthetic init: weights ~ N(0, 0.01), small biases."""
    params = []
    for i, cout in enumerate(num_channels):
        cin = num_inputs if i == 0 else num_channels[i - 1]
        key, k0, k1, k2, k3, k4, k5 = jax.random.split(key, 7)
        w1 = 0.01 * jax.random.normal(k0, (cout, cin, kernel_size), jnp.float32)
        b1 = 0.01 * jax.random.normal(k1, (cout,), jnp.float32)
        w2 = 0.01 * jax.random.normal(k2, (cout, cout, kernel_size), jnp.float32)
        b2 = 0.01 * jax.random.normal(k3, (cout,), jnp.float32)
        if cin != cout:
            wd = 0.01 * jax.random.normal(k4, (cout, cin, 1), jnp.float32)
            bd = 0.01 * jax.random.normal(k5, (cout,), jnp.float32)
        else:
            wd, bd = None, None
        params.append(dict(w1=w1, b1=b1, w2=w2, b2=b2, wd=wd, bd=bd))
    return params


# ---------------- pure-JAX reference (for correctness check) ----------------
def _ref_causal_conv(x, w, b, d):
    # x: (B, C, L), w: (Cout, Cin, K)
    p = (w.shape[2] - 1) * d
    y = jax.lax.conv_general_dilated(
        x, w, window_strides=(1,), padding=[(p, 0)], rhs_dilation=(d,),
        dimension_numbers=('NCW', 'OIW', 'NCW'))
    return y + b[None, :, None]


def ref_tcn(x_bcl, params, kernel_size):
    h = x_bcl
    for i, prm in enumerate(params):
        d = 2 ** i
        o = jnp.maximum(_ref_causal_conv(h, prm['w1'], prm['b1'], d), 0.0)
        o = jnp.maximum(_ref_causal_conv(o, prm['w2'], prm['b2'], d), 0.0)
        res = h if prm['wd'] is None else _ref_causal_conv(h, prm['wd'], prm['bd'], 1)
        h = jnp.maximum(o + res, 0.0)
    return h


if __name__ == "__main__":
    key = jax.random.PRNGKey(0)
    k_x, k_p = jax.random.split(key)

    B, C, L = 2, 4, 16
    num_channels = [8, 8]   # block 0: 1x1 downsample (4->8); block 1: identity residual
    kernel_size = 2

    x = jax.random.normal(k_x, (B, C, L), jnp.float32)
    params = init_tcn_params(k_p, C, num_channels, kernel_size)

    # time_tile=8 -> 2 time tiles per batch element, exercising halo recompute
    # and the pl.when-gated causal masking across a tile boundary.
    out = tcn_forward(x, params, kernel_size, time_tile=8)
    out = jax.block_until_ready(out)

    assert out.shape == (B, num_channels[-1], L), out.shape
    ref = ref_tcn(x, params, kernel_size)
    err = float(jnp.max(jnp.abs(out - ref)))
    assert err < 5e-3, ("max abs diff vs f32 reference (bf16 storage/matmuls):", err)

    print("KERNEL_OK")
</pallas_src>

<mosaic_0001>
module attributes {stable_mosaic.version = 11 : i64} {
  func.func @kernel(%arg0: i32, %arg1: i32, %arg2: memref<1x1x6x128xbf16, #tpu.memory_space<vmem>>, %arg3: memref<1x8x128xbf16, #tpu.memory_space<vmem>>, %arg4: memref<256x128xbf16, #tpu.memory_space<vmem>>, %arg5: memref<1x128xf32, #tpu.memory_space<vmem>>, %arg6: memref<256x128xbf16, #tpu.memory_space<vmem>>, %arg7: memref<1x128xf32, #tpu.memory_space<vmem>>, %arg8: memref<128x128xbf16, #tpu.memory_space<vmem>>, %arg9: memref<1x128xf32, #tpu.memory_space<vmem>>, %arg10: memref<256x128xbf16, #tpu.memory_space<vmem>>, %arg11: memref<1x128xf32, #tpu.memory_space<vmem>>, %arg12: memref<256x128xbf16, #tpu.memory_space<vmem>>, %arg13: memref<1x128xf32, #tpu.memory_space<vmem>>, %arg14: memref<1x8x128xbf16, #tpu.memory_space<vmem>>, %arg15: memref<14x128xbf16, #tpu.memory_space<vmem>>, %arg16: memref<14x128xbf16, #tpu.memory_space<vmem>>, %arg17: memref<14x128xbf16, #tpu.memory_space<vmem>>) attributes {dimension_semantics = [#tpu.dimension_semantics<parallel>, #tpu.dimension_semantics<parallel>], iteration_bounds = array<i64: 2, 2>, scalar_prefetch = 0 : i64, scratch_operands = 3 : i64, tpu.core_type = #tpu.core_type<tc>, window_params = [{transform_indices = @transform_0, window_bounds = array<i64: 1, 1, 6, 128>}, {transform_indices = @transform_1, window_bounds = array<i64: 1, 8, 128>}, {pipeline_mode = #tpu.pipeline_mode<synchronous>, transform_indices = @transform_2, window_bounds = array<i64: 256, 128>}, {pipeline_mode = #tpu.pipeline_mode<synchronous>, transform_indices = @transform_3, window_bounds = array<i64: 1, 128>}, {pipeline_mode = #tpu.pipeline_mode<synchronous>, transform_indices = @transform_4, window_bounds = array<i64: 256, 128>}, {pipeline_mode = #tpu.pipeline_mode<synchronous>, transform_indices = @transform_5, window_bounds = array<i64: 1, 128>}, {pipeline_mode = #tpu.pipeline_mode<synchronous>, transform_indices = @transform_6, window_bounds = array<i64: 128, 128>}, {pipeline_mode = #tpu.pipeline_mode<synchronous>, transform_indices = @transform_7, window_bounds = array<i64: 1, 128>}, {pipeline_mode = #tpu.pipeline_mode<synchronous>, transform_indices = @transform_8, window_bounds = array<i64: 256, 128>}, {pipeline_mode = #tpu.pipeline_mode<synchronous>, transform_indices = @transform_9, window_bounds = array<i64: 1, 128>}, {pipeline_mode = #tpu.pipeline_mode<synchronous>, transform_indices = @transform_10, window_bounds = array<i64: 256, 128>}, {pipeline_mode = #tpu.pipeline_mode<synchronous>, transform_indices = @transform_11, window_bounds = array<i64: 1, 128>}, {transform_indices = @transform_12, window_bounds = array<i64: 1, 8, 128>}]} {
    %c8_i32 = arith.constant 8 : i32
    %0 = arith.muli %arg1, %c8_i32 : i32
    %c0 = arith.constant 0 : index
    %c0_0 = arith.constant 0 : index
    %c0_1 = arith.constant 0 : index
    %c0_2 = arith.constant 0 : index
    %1 = vector.load %arg2[%c0, %c0_0, %c0_1, %c0_2] : memref<1x1x6x128xbf16, #tpu.memory_space<vmem>>, vector<1x1x6x128xbf16>
    %2 = vector.shape_cast %1 : vector<1x1x6x128xbf16> to vector<6x128xbf16>
    %c0_3 = arith.constant 0 : index
    %c0_4 = arith.constant 0 : index
    %3 = vector.load %arg15[%c0_3, %c0_4] : memref<14x128xbf16, #tpu.memory_space<vmem>>, vector<6x128xbf16>
    tpu.vector_store %arg15[%c0_3, %c0_4], %2 {strides = array<i32>} : memref<14x128xbf16, #tpu.memory_space<vmem>>, vector<6x128xbf16>,
    %c0_5 = arith.constant 0 : index
    %c0_6 = arith.constant 0 : index
    %c0_7 = arith.constant 0 : index
    %4 = vector.load %arg3[%c0_5, %c0_6, %c0_7] : memref<1x8x128xbf16, #tpu.memory_space<vmem>>, vector<1x8x128xbf16>
    %5 = vector.shape_cast %4 : vector<1x8x128xbf16> to vector<8x128xbf16>
    %c6 = arith.constant 6 : index
    %c0_8 = arith.constant 0 : index
    %6 = vector.load %arg15[%c6, %c0_8] : memref<14x128xbf16, #tpu.memory_space<vmem>>, vector<8x128xbf16>
    tpu.vector_store %arg15[%c6, %c0_8], %5 {strides = array<i32>} : memref<14x128xbf16, #tpu.memory_space<vmem>>, vector<8x128xbf16>,
    %c0_9 = arith.constant 0 : index
    %c0_10 = arith.constant 0 : index
    %7 = vector.load %arg15[%c0_9, %c0_10] : memref<14x128xbf16, #tpu.memory_space<vmem>>, vector<13x128xbf16>
    %c1 = arith.constant 1 : index
    %c0_11 = arith.constant 0 : index
    %8 = vector.load %arg15[%c1, %c0_11] : memref<14x128xbf16, #tpu.memory_space<vmem>>, vector<13x128xbf16>
    %9 = tpu.concatenate %7, %8 in 1 : vector<13x128xbf16>, vector<13x128xbf16> -> vector<13x256xbf16>
    %c0_12 = arith.constant 0 : index
    %c0_13 = arith.constant 0 : index
    %10 = vector.load %arg4[%c0_12, %c0_13] : memref<256x128xbf16, #tpu.memory_space<vmem>>, vector<256x128xbf16>
    %cst = arith.constant dense<0.000000e+00> : vector<13x128xf32>
    %11 = tpu.matmul %9, %10, %cst {dimension_numbers = #tpu.dot_dimension_numbers<[1], [0], [0], [1], [0, 0, 1, 1], [], []>} : vector<13x256xbf16>, vector<256x128xbf16>, vector<13x128xf32> -> vector<13x128xf32>
    %c0_14 = arith.constant 0 : index
    %c0_15 = arith.constant 0 : index
    %12 = vector.load %arg5[%c0_14, %c0_15] : memref<1x128xf32, #tpu.memory_space<vmem>>, vector<1x128xf32>
    %13 = vector.broadcast %12 : vector<1x128xf32> to vector<13x128xf32>
    %14 = arith.addf %11, %13 : vector<13x128xf32>
    %cst_16 = arith.constant 0.000000e+00 : f32
    %15 = vector.broadcast %cst_16 : f32 to vector<13x128xf32>
    %16 = arith.maximumf %14, %15 : vector<13x128xf32>
    %17 = arith.truncf %16 : vector<13x128xf32> to vector<13x128xbf16>
    %c0_17 = arith.constant 0 : index
    %c0_18 = arith.constant 0 : index
    %18 = vector.load %arg16[%c0_17, %c0_18] : memref<14x128xbf16, #tpu.memory_space<vmem>>, vector<13x128xbf16>
    tpu.vector_store %arg16[%c0_17, %c0_18], %17 {strides = array<i32>} : memref<14x128xbf16, #tpu.memory_space<vmem>>, vector<13x128xbf16>,
    %c5_i32 = arith.constant 5 : i32
    %19 = arith.cmpi slt, %0, %c5_i32 : i32
    %20 = arith.extui %19 : i1 to i32
    %c0_i32 = arith.constant 0 : i32
    %21 = arith.cmpi ne, %20, %c0_i32 : i32
    scf.if %21 {
      %c5_i32_67 = arith.constant 5 : i32
      %80 = arith.subi %0, %c5_i32_67 : i32
      %81 = tpu.iota {dimensions = array<i32: 0>} : vector<5x1xi32>
      %82 = vector.broadcast %80 : i32 to vector<5x1xi32>
      %83 = arith.addi %82, %81 : vector<5x1xi32>
      %c0_68 = arith.constant 0 : index
      %c0_69 = arith.constant 0 : index
      %84 = vector.load %arg16[%c0_68, %c0_69] : memref<14x128xbf16, #tpu.memory_space<vmem>>, vector<5x128xbf16>
      %c0_i32_70 = arith.constant 0 : i32
      %85 = vector.broadcast %c0_i32_70 : i32 to vector<5x1xi32>
      %86 = arith.cmpi sge, %83, %85 : vector<5x1xi32>
      %cst_71 = arith.constant 0.000000e+00 : bf16
      %87 = vector.broadcast %cst_71 : bf16 to vector<5x128xbf16>
      %88 = vector.shape_cast %86 : vector<5x1xi1> to vector<5x1xi1>
      %89 = vector.broadcast %88 : vector<5x1xi1> to vector<5x128xi1>
      %90 = arith.select %89, %84, %87 : vector<5x128xi1>, vector<5x128xbf16>
      %c0_72 = arith.constant 0 : index
      %c0_73 = arith.constant 0 : index
      %91 = vector.load %arg16[%c0_72, %c0_73] : memref<14x128xbf16, #tpu.memory_space<vmem>>, vector<5x128xbf16>
      tpu.vector_store %arg16[%c0_72, %c0_73], %90 {strides = array<i32>} : memref<14x128xbf16, #tpu.memory_space<vmem>>, vector<5x128xbf16>,
    } else {
    }
    %c0_19 = arith.constant 0 : index
    %c0_20 = arith.constant 0 : index
    %22 = vector.load %arg16[%c0_19, %c0_20] : memref<14x128xbf16, #tpu.memory_space<vmem>>, vector<12x128xbf16>
    %c1_21 = arith.constant 1 : index
    %c0_22 = arith.constant 0 : index
    %23 = vector.load %arg16[%c1_21, %c0_22] : memref<14x128xbf16, #tpu.memory_space<vmem>>, vector<12x128xbf16>
    %24 = tpu.concatenate %22, %23 in 1 : vector<12x128xbf16>, vector<12x128xbf16> -> vector<12x256xbf16>
    %c0_23 = arith.constant 0 : index
    %c0_24 = arith.constant 0 : index
    %25 = vector.load %arg6[%c0_23, %c0_24] : memref<256x128xbf16, #tpu.memory_space<vmem>>, vector<256x128xbf16>
    %cst_25 = arith.constant dense<0.000000e+00> : vector<12x128xf32>
    %26 = tpu.matmul %24, %25, %cst_25 {dimension_numbers = #tpu.dot_dimension_numbers<[1], [0], [0], [1], [0, 0, 1, 1], [], []>} : vector<12x256xbf16>, vector<256x128xbf16>, vector<12x128xf32> -> vector<12x128xf32>
    %c0_26 = arith.constant 0 : index
    %c0_27 = arith.constant 0 : index
    %27 = vector.load %arg7[%c0_26, %c0_27] : memref<1x128xf32, #tpu.memory_space<vmem>>, vector<1x128xf32>
    %28 = vector.broadcast %27 : vector<1x128xf32> to vector<12x128xf32>
    %29 = arith.addf %26, %28 : vector<12x128xf32>
    %cst_28 = arith.constant 0.000000e+00 : f32
    %30 = vector.broadcast %cst_28 : f32 to vector<12x128xf32>
    %31 = arith.maximumf %29, %30 : vector<12x128xf32>
    %c2 = arith.constant 2 : index
    %c0_29 = arith.constant 0 : index
    %32 = vector.load %arg15[%c2, %c0_29] : memref<14x128xbf16, #tpu.memory_space<vmem>>, vector<12x128xbf16>
    %c0_30 = arith.constant 0 : index
    %c0_31 = arith.constant 0 : index
    %33 = vector.load %arg8[%c0_30, %c0_31] : memref<128x128xbf16, #tpu.memory_space<vmem>>, vector<128x128xbf16>
    %cst_32 = arith.constant dense<0.000000e+00> : vector<12x128xf32>
    %34 = tpu.matmul %32, %33, %cst_32 {dimension_numbers = #tpu.dot_dimension_numbers<[1], [0], [0], [1], [0, 0, 1, 1], [], []>} : vector<12x128xbf16>, vector<128x128xbf16>, vector<12x128xf32> -> vector<12x128xf32>
    %c0_33 = arith.constant 0 : index
    %c0_34 = arith.constant 0 : index
    %35 = vector.load %arg9[%c0_33, %c0_34] : memref<1x128xf32, #tpu.memory_space<vmem>>, vector<1x128xf32>
    %36 = vector.broadcast %35 : vector<1x128xf32> to vector<12x128xf32>
    %37 = arith.addf %34, %36 : vector<12x128xf32>
    %38 = arith.addf %31, %37 : vector<12x128xf32>
    %cst_35 = arith.constant 0.000000e+00 : f32
    %39 = vector.broadcast %cst_35 : f32 to vector<12x128xf32>
    %40 = arith.maximumf %38, %39 : vector<12x128xf32>
    %41 = arith.truncf %40 : vector<12x128xf32> to vector<12x128xbf16>
    %c0_36 = arith.constant 0 : index
    %c0_37 = arith.constant 0 : index
    %42 = vector.load %arg17[%c0_36, %c0_37] : memref<14x128xbf16, #tpu.memory_space<vmem>>, vector<12x128xbf16>
    tpu.vector_store %arg17[%c0_36, %c0_37], %41 {strides = array<i32>} : memref<14x128xbf16, #tpu.memory_space<vmem>>, vector<12x128xbf16>,
    %c4_i32 = arith.constant 4 : i32
    %43 = arith.cmpi slt, %0, %c4_i32 : i32
    %44 = arith.extui %43 : i1 to i32
    %c0_i32_38 = arith.constant 0 : i32
    %45 = arith.cmpi ne, %44, %c0_i32_38 : i32
    scf.if %45 {
      %c4_i32_67 = arith.constant 4 : i32
      %80 = arith.subi %0, %c4_i32_67 : i32
      %81 = tpu.iota {dimensions = array<i32: 0>} : vector<4x1xi32>
      %82 = vector.broadcast %80 : i32 to vector<4x1xi32>
      %83 = arith.addi %82, %81 : vector<4x1xi32>
      %c0_68 = arith.constant 0 : index
      %c0_69 = arith.constant 0 : index
      %84 = vector.load %arg17[%c0_68, %c0_69] : memref<14x128xbf16, #tpu.memory_space<vmem>>, vector<4x128xbf16>
      %c0_i32_70 = arith.constant 0 : i32
      %85 = vector.broadcast %c0_i32_70 : i32 to vector<4x1xi32>
      %86 = arith.cmpi sge, %83, %85 : vector<4x1xi32>
      %cst_71 = arith.constant 0.000000e+00 : bf16
      %87 = vector.broadcast %cst_71 : bf16 to vector<4x128xbf16>
      %88 = vector.shape_cast %86 : vector<4x1xi1> to vector<4x1xi1>
      %89 = vector.broadcast %88 : vector<4x1xi1> to vector<4x128xi1>
      %90 = arith.select %89, %84, %87 : vector<4x128xi1>, vector<4x128xbf16>
      %c0_72 = arith.constant 0 : index
      %c0_73 = arith.constant 0 : index
      %91 = vector.load %arg17[%c0_72, %c0_73] : memref<14x128xbf16, #tpu.memory_space<vmem>>, vector<4x128xbf16>
      tpu.vector_store %arg17[%c0_72, %c0_73], %90 {strides = array<i32>} : memref<14x128xbf16, #tpu.memory_space<vmem>>, vector<4x128xbf16>,
    } else {
    }
    %c0_39 = arith.constant 0 : index
    %c0_40 = arith.constant 0 : index
    %46 = vector.load %arg17[%c0_39, %c0_40] : memref<14x128xbf16, #tpu.memory_space<vmem>>, vector<10x128xbf16>
    %c2_41 = arith.constant 2 : index
    %c0_42 = arith.constant 0 : index
    %47 = vector.load %arg17[%c2_41, %c0_42] : memref<14x128xbf16, #tpu.memory_space<vmem>>, vector<10x128xbf16>
    %48 = tpu.concatenate %46, %47 in 1 : vector<10x128xbf16>, vector<10x128xbf16> -> vector<10x256xbf16>
    %c0_43 = arith.constant 0 : index
    %c0_44 = arith.constant 0 : index
    %49 = vector.load %arg10[%c0_43, %c0_44] : memref<256x128xbf16, #tpu.memory_space<vmem>>, vector<256x128xbf16>
    %cst_45 = arith.constant dense<0.000000e+00> : vector<10x128xf32>
    %50 = tpu.matmul %48, %49, %cst_45 {dimension_numbers = #tpu.dot_dimension_numbers<[1], [0], [0], [1], [0, 0, 1, 1], [], []>} : vector<10x256xbf16>, vector<256x128xbf16>, vector<10x128xf32> -> vector<10x128xf32>
    %c0_46 = arith.constant 0 : index
    %c0_47 = arith.constant 0 : index
    %51 = vector.load %arg11[%c0_46, %c0_47] : memref<1x128xf32, #tpu.memory_space<vmem>>, vector<1x128xf32>
    %52 = vector.broadcast %51 : vector<1x128xf32> to vector<10x128xf32>
    %53 = arith.addf %50, %52 : vector<10x128xf32>
    %cst_48 = arith.constant 0.000000e+00 : f32
    %54 = vector.broadcast %cst_48 : f32 to vector<10x128xf32>
    %55 = arith.maximumf %53, %54 : vector<10x128xf32>
    %56 = arith.truncf %55 : vector<10x128xf32> to vector<10x128xbf16>
    %c0_49 = arith.constant 0 : index
    %c0_50 = arith.constant 0 : index
    %57 = vector.load %arg15[%c0_49, %c0_50] : memref<14x128xbf16, #tpu.memory_space<vmem>>, vector<10x128xbf16>
    tpu.vector_store %arg15[%c0_49, %c0_50], %56 {strides = array<i32>} : memref<14x128xbf16, #tpu.memory_space<vmem>>, vector<10x128xbf16>,
    %c2_i32 = arith.constant 2 : i32
    %58 = arith.cmpi slt, %0, %c2_i32 : i32
    %59 = arith.extui %58 : i1 to i32
    %c0_i32_51 = arith.constant 0 : i32
    %60 = arith.cmpi ne, %59, %c0_i32_51 : i32
    scf.if %60 {
      %c2_i32_67 = arith.constant 2 : i32
      %80 = arith.subi %0, %c2_i32_67 : i32
      %81 = tpu.iota {dimensions = array<i32: 0>} : vector<2x1xi32>
      %82 = vector.broadcast %80 : i32 to vector<2x1xi32>
      %83 = arith.addi %82, %81 : vector<2x1xi32>
      %c0_68 = arith.constant 0 : index
      %c0_69 = arith.constant 0 : index
      %84 = vector.load %arg15[%c0_68, %c0_69] : memref<14x128xbf16, #tpu.memory_space<vmem>>, vector<2x128xbf16>
      %c0_i32_70 = arith.constant 0 : i32
      %85 = vector.broadcast %c0_i32_70 : i32 to vector<2x1xi32>
      %86 = arith.cmpi sge, %83, %85 : vector<2x1xi32>
      %cst_71 = arith.constant 0.000000e+00 : bf16
      %87 = vector.broadcast %cst_71 : bf16 to vector<2x128xbf16>
      %88 = vector.shape_cast %86 : vector<2x1xi1> to vector<2x1xi1>
      %89 = vector.broadcast %88 : vector<2x1xi1> to vector<2x128xi1>
      %90 = arith.select %89, %84, %87 : vector<2x128xi1>, vector<2x128xbf16>
      %c0_72 = arith.constant 0 : index
      %c0_73 = arith.constant 0 : index
      %91 = vector.load %arg15[%c0_72, %c0_73] : memref<14x128xbf16, #tpu.memory_space<vmem>>, vector<2x128xbf16>
      tpu.vector_store %arg15[%c0_72, %c0_73], %90 {strides = array<i32>} : memref<14x128xbf16, #tpu.memory_space<vmem>>, vector<2x128xbf16>,
    } else {
    }
    %c0_52 = arith.constant 0 : index
    %c0_53 = arith.constant 0 : index
    %61 = vector.load %arg15[%c0_52, %c0_53] : memref<14x128xbf16, #tpu.memory_space<vmem>>, vector<8x128xbf16>
    %c2_54 = arith.constant 2 : index
    %c0_55 = arith.constant 0 : index
    %62 = vector.load %arg15[%c2_54, %c0_55] : memref<14x128xbf16, #tpu.memory_space<vmem>>, vector<8x128xbf16>
    %63 = tpu.concatenate %61, %62 in 1 : vector<8x128xbf16>, vector<8x128xbf16> -> vector<8x256xbf16>
    %c0_56 = arith.constant 0 : index
    %c0_57 = arith.constant 0 : index
    %64 = vector.load %arg12[%c0_56, %c0_57] : memref<256x128xbf16, #tpu.memory_space<vmem>>, vector<256x128xbf16>
    %cst_58 = arith.constant dense<0.000000e+00> : vector<8x128xf32>
    %65 = tpu.matmul %63, %64, %cst_58 {dimension_numbers = #tpu.dot_dimension_numbers<[1], [0], [0], [1], [0, 0, 1, 1], [], []>} : vector<8x256xbf16>, vector<256x128xbf16>, vector<8x128xf32> -> vector<8x128xf32>
    %c0_59 = arith.constant 0 : index
    %c0_60 = arith.constant 0 : index
    %66 = vector.load %arg13[%c0_59, %c0_60] : memref<1x128xf32, #tpu.memory_space<vmem>>, vector<1x128xf32>
    %67 = vector.broadcast %66 : vector<1x128xf32> to vector<8x128xf32>
    %68 = arith.addf %65, %67 : vector<8x128xf32>
    %cst_61 = arith.constant 0.000000e+00 : f32
    %69 = vector.broadcast %cst_61 : f32 to vector<8x128xf32>
    %70 = arith.maximumf %68, %69 : vector<8x128xf32>
    %c4 = arith.constant 4 : index
    %c0_62 = arith.constant 0 : index
    %71 = vector.load %arg17[%c4, %c0_62] : memref<14x128xbf16, #tpu.memory_space<vmem>>, vector<8x128xbf16>
    %72 = arith.extf %71 : vector<8x128xbf16> to vector<8x128xf32>
    %73 = arith.addf %70, %72 : vector<8x128xf32>
    %cst_63 = arith.constant 0.000000e+00 : f32
    %74 = vector.broadcast %cst_63 : f32 to vector<8x128xf32>
    %75 = arith.maximumf %73, %74 : vector<8x128xf32>
    %76 = arith.truncf %75 : vector<8x128xf32> to vector<8x128xbf16>
    %c0_64 = arith.constant 0 : index
    %c0_65 = arith.constant 0 : index
    %c0_66 = arith.constant 0 : index
    %77 = vector.load %arg14[%c0_64, %c0_65, %c0_66] : memref<1x8x128xbf16, #tpu.memory_space<vmem>>, vector<1x8x128xbf16>
    %78 = vector.shape_cast %77 : vector<1x8x128xbf16> to vector<8x128xbf16>
    %79 = vector.shape_cast %76 : vector<8x128xbf16> to vector<1x8x128xbf16>
    tpu.vector_store %arg14[%c0_64, %c0_65, %c0_66], %79 {strides = array<i32>} : memref<1x8x128xbf16, #tpu.memory_space<vmem>>, vector<1x8x128xbf16>,
    return
  }
  func.func @transform_0(%arg0: i32, %arg1: i32) -> (i32, i32, i32, i32) {
    %c0_i32 = arith.constant 0 : i32
    %c0_i32_0 = arith.constant 0 : i32
    %c0_i32_1 = arith.constant 0 : i32
    return %arg0, %arg1, %c0_i32, %c0_i32_0 : i32, i32, i32, i32
  }
  func.func @transform_1(%arg0: i32, %arg1: i32) -> (i32, i32, i32) {
    %c0_i32 = arith.constant 0 : i32
    %c0_i32_0 = arith.constant 0 : i32
    return %arg0, %arg1, %c0_i32 : i32, i32, i32
  }
  func.func @transform_2(%arg0: i32, %arg1: i32) -> (i32, i32) {
    %c0_i32 = arith.constant 0 : i32
    %c0_i32_0 = arith.constant 0 : i32
    %c0_i32_1 = arith.constant 0 : i32
    return %c0_i32, %c0_i32_0 : i32, i32
  }
  func.func @transform_3(%arg0: i32, %arg1: i32) -> (i32, i32) {
    %c0_i32 = arith.constant 0 : i32
    %c0_i32_0 = arith.constant 0 : i32
    %c0_i32_1 = arith.constant 0 : i32
    return %c0_i32, %c0_i32_0 : i32, i32
  }
  func.func @transform_4(%arg0: i32, %arg1: i32) -> (i32, i32) {
    %c0_i32 = arith.constant 0 : i32
    %c0_i32_0 = arith.constant 0 : i32
    %c0_i32_1 = arith.constant 0 : i32
    return %c0_i32, %c0_i32_0 : i32, i32
  }
  func.func @transform_5(%arg0: i32, %arg1: i32) -> (i32, i32) {
    %c0_i32 = arith.constant 0 : i32
    %c0_i32_0 = arith.constant 0 : i32
    %c0_i32_1 = arith.constant 0 : i32
    return %c0_i32, %c0_i32_0 : i32, i32
  }
  func.func @transform_6(%arg0: i32, %arg1: i32) -> (i32, i32) {
    %c0_i32 = arith.constant 0 : i32
    %c0_i32_0 = arith.constant 0 : i32
    %c0_i32_1 = arith.constant 0 : i32
    return %c0_i32, %c0_i32_0 : i32, i32
  }
  func.func @transform_7(%arg0: i32, %arg1: i32) -> (i32, i32) {
    %c0_i32 = arith.constant 0 : i32
    %c0_i32_0 = arith.constant 0 : i32
    %c0_i32_1 = arith.constant 0 : i32
    return %c0_i32, %c0_i32_0 : i32, i32
  }
  func.func @transform_8(%arg0: i32, %arg1: i32) -> (i32, i32) {
    %c0_i32 = arith.constant 0 : i32
    %c0_i32_0 = arith.constant 0 : i32
    %c0_i32_1 = arith.constant 0 : i32
    return %c0_i32, %c0_i32_0 : i32, i32
  }
  func.func @transform_9(%arg0: i32, %arg1: i32) -> (i32, i32) {
    %c0_i32 = arith.constant 0 : i32
    %c0_i32_0 = arith.constant 0 : i32
    %c0_i32_1 = arith.constant 0 : i32
    return %c0_i32, %c0_i32_0 : i32, i32
  }
  func.func @transform_10(%arg0: i32, %arg1: i32) -> (i32, i32) {
    %c0_i32 = arith.constant 0 : i32
    %c0_i32_0 = arith.constant 0 : i32
    %c0_i32_1 = arith.constant 0 : i32
    return %c0_i32, %c0_i32_0 : i32, i32
  }
  func.func @transform_11(%arg0: i32, %arg1: i32) -> (i32, i32) {
    %c0_i32 = arith.constant 0 : i32
    %c0_i32_0 = arith.constant 0 : i32
    %c0_i32_1 = arith.constant 0 : i32
    return %c0_i32, %c0_i32_0 : i32, i32
  }
  func.func @transform_12(%arg0: i32, %arg1: i32) -> (i32, i32, i32) {
    %c0_i32 = arith.constant 0 : i32
    %c0_i32_0 = arith.constant 0 : i32
    return %arg0, %arg1, %c0_i32 : i32, i32, i32
  }
}

</mosaic_0001>

<bundles_post_ra>
// kernel: tpu_custom_call.1
= control target key start
LH: loop header
LB: loop body
LE: loop exit
PB: predicated region body
PF: predicated region fallthrough
CT: control target
= control target key end

     0   :  { %s2809_s0 = inlined_call_operand.vmem [shape: bf16[2,2,6,128], index: 0, kind: input, shape index: {}]   ;;  %s2810_s1 = inlined_call_operand.vmem [shape: bf16[2,16,128], index: 1, kind: input, shape index: {}]   ;;  %s2811_s2 = inlined_call_operand.hbm [shape: bf16[256,128], index: 2, kind: input, shape index: {}]   ;;  %s2812_s3 = inlined_call_operand.vmem [shape: f32[1,128], index: 3, kind: input, shape index: {}]   ;;  %s2813_s4 = inlined_call_operand.hbm [shape: bf16[256,128], index: 4, kind: input, shape index: {}]   ;;  %s2814_s5 = inlined_call_operand.vmem [shape: f32[1,128], index: 5, kind: input, shape index: {}]   ;;  %s2815_s6 = inlined_call_operand.hbm [shape: bf16[128,128], index: 6, kind: input, shape index: {}]   ;;  %s2816_s7 = inlined_call_operand.vmem [shape: f32[1,128], index: 7, kind: input, shape index: {}]   ;;  %s2817_s8 = inlined_call_operand.hbm [shape: bf16[256,128], index: 8, kind: input, shape index: {}]   ;;  %s2818_s9 = inlined_call_operand.vmem [shape: f32[1,128], index: 9, kind: input, shape index: {}]   ;;  %s2819_s10 = inlined_call_operand.hbm [shape: bf16[256,128], index: 10, kind: input, shape index: {}]   ;;  %s2820_s11 = inlined_call_operand.vmem [shape: f32[1,128], index: 11, kind: input, shape index: {}]   ;;  %s2821_s12 = inlined_call_operand.hbm [shape: bf16[2,16,128], index: 12, kind: output, shape index: {}]  }
   0x1   :  { %2838 = sst [smem:[#allocation29_spill]] %s2813_s4 }
   0x2   :  { %2839 = sst [smem:[#allocation30_spill]] %s2818_s9 }
   0x3   :  { %2840 = sst [smem:[#allocation31_spill]] %s2820_s11 }
   0x4   :  { %2841 = sst [smem:[#allocation32_spill]] %s2821_s12 }
   0x5   :  { %17 = vsyncpa [#allocation6], 0 }
   0x6   :  { %18 = vsyncpa [#allocation9], 0 }
   0x7   :  { %19 = vsyncpa [#allocation12], 0 }
   0x8   :  { %20 = vsyncpa [#allocation7], 0 }
   0x9   :  { %22 = vsyncpa [#allocation7 + $0x1], 0  ;;  %s2485_s21 = smov 0   ;;  %s2487_s22 = smov 0  }
   0xa   :  { %s2489_s23 = smov 0   ;;  %s2491_s24 = smov 0  }
   0xb   :  { %s2493_s25 = smov 0   ;;  %s2495_s26 = smov 0  }
   0xc   :  { %s2497_s27 = smov 0   ;;  %s2499_s28 = smov 0  }
   0xd LB: > { %2842 = sst [smem:[#allocation19_spill]] %s2380_s21  ;;  %s1712_s29 = sadd.s32 4294967295, %s2408_s28   ;;  %s2408_s28 = sphi %s2499_s28, %s28_s28   ;;  %s2404_s27 = sphi %s2497_s27, %s2882_s27   ;;  %s2400_s26 = sphi %s2495_s26, %s2877_s26   ;;  %s2396_s25 = sphi %s2493_s25, %s2881_s25   ;;  %s2392_s24 = sphi %s2491_s24, %s2875_s24   ;;  %s2388_s23 = sphi %s2489_s23, %s2874_s23   ;;  %s2384_s22 = sphi %s2487_s22, %s2880_s22   ;;  %s2380_s21 = sphi %s2485_s21, %s2879_s21  }
   0xe   : > { %2843 = sst [smem:[#allocation20_spill]] %s2388_s23  ;;  %s1713_s30 = sadd.s32 4294967294, %s2408_s28  }
   0xf   : > { %2844 = sst [smem:[#allocation21_spill]] %s2400_s26  ;;  %s37_s13 = sadd.s32 1, %s2400_s26 }
  0x10   : > { %2845 = sst [smem:[#allocation22_spill]] %s2404_s27  ;;  %s40_s14 = sadd.s32 1, %s2404_s27 }
  0x11   : > { %2846 = sst [smem:[#allocation23_spill]] %s2408_s28  ;;  %p38_p0 = scmp.ge.s32.totalorder %s37_s13, 2 }
  0x12   : > { %s315_s15 = sadd.s32 1, %s2388_s23  ;;  %p325_p1 = scmp.ne.s32.totalorder %s2388_s23, %s2384_s22 }
  0x13   : > { %p326_p2 = scmp.eq.s32.totalorder %s1712_s29, 3  ;;  %s2884_s13 = smov (%p38_p0, %s37_s13), 0 }
  0x14   : > { %2847 = sst [smem:[#allocation24_spill]] %s2884_s13  ;;  %s2886_s14 = smov (!%p38_p0, %s40_s14), %s2404_s27 }
  0x15   : > { %s311_s16 = ssub.s32 %s2400_s26, %s2884_s13  ;;  %p2537_p3 = por %p326_p2, %p325_p1 }
  0x16   : > { %p42_p4 = scmp.ge.s32.totalorder %s2886_s14, 2  ;;  %p331_p5 = scmp.ne.s32.totalorder %s2384_s22, %s2380_s21 }
  0x17   : > { %s2848_s17 = scalar_select %p2537_p3, 1, 0 }
  0x18   : > { %p332_p6 = scmp.eq.s32.totalorder %s1713_s30, 3  ;;  %p1714_p7 = scmp.ge.s32.totalorder %s2408_s28, 1 }
  0x19   : > { %2849 = sst [smem:[#allocation25_spill]] %s2848_s17  ;;  %s2888_s14 = smov (%p42_p4, %s2886_s14), 0 }
  0x1a   : > { %2850 = sst [smem:[#allocation26_spill]] %s2888_s14  ;;  %p2546_p8 = por %p332_p6, %p331_p5 }
  0x1b   : > { %p339_p9 = scmp.lt.s32.totalorder %s2408_s28, 5  ;;  %s310_s19 = ssub.s32 %s2404_s27, %s2888_s14 }
  0x1c   : > { %s2851_s18 = scalar_select %p2546_p8, 1, 0 }
  0x1d   : > { %s312_s20 = sor.u32 %s311_s16, %s310_s19  ;;  %p2553_p10 = pnand %p1714_p7, %p339_p9 }
  0x1e   : > { %2852 = sst [smem:[#allocation27_spill]] %s2851_s18  ;;  %p313_p11 = scmp.eq.s32.totalorder %s312_s20, 0 }
  0x1f   : > { %s2853_s13 = scalar_select %p2553_p10, 1, 0 }
  0x20   : > { %p2557_p12 = scmp.eq.s32.totalorder %s1712_s29, 0  ;;  %p1979_p13 = pneg %p2553_p10 }
  0x21   : > { %s2564_s30 = scalar_select %p313_p11, %s2388_s23, %s315_s15  }
  0x22   : > { %s2854_s26 = scalar_select %p2557_p12, 1, 0 }
  0x23   : > { %2855 = sst [smem:[#allocation28_spill]] %s2564_s30  ;;  %p2568_p0 = pnand %p2557_p12, %p1979_p13 }
  0x24   : > { %s2410_s16 = smov [#allocation8]   ;;  %s2411_s14 = smov [#allocation11]  }
  0x25   : > { %s367_s19 = sshll.u32 %s2410_s16, 4  ;;  %s399_s20 = sshll.u32 %s2411_s14, 4  ;;  %s368_s19 = int_to_ptr.vmem [resolvable:$true] %s367_s19  ;;  %s400_s20 = int_to_ptr.vmem [resolvable:$true] %s399_s20 }
  0x26   : > { %s2857_s4 = sld [smem:[#allocation29_spill]]  ;;  %p2580_p2 = pneg %p2568_p0 }
  0x2c   : > { %s2162_s21 = scalar_lea.hbm %s2857_s4, 2048 }
  0x2d   : > { %p2163_p1 = scmp.ne.s32.totalorder %s2857_s4, %s2162_s21  ;;  %p2169_p6 = scmp.lt.u32.totalorder %s2162_s21, %s2857_s4 }
  0x2f   : > { %p2165_p4 = pnand %p2580_p2, %p2163_p1 }
  0x31   : > { %p2166_p5 = pneg %p2165_p4 }
  0x33   : > { %p2171_p7 = pnand %p2169_p6, %p2166_p5 }
  0x35   : > { %2174 = shalt.err (!%p2171_p7)
}
  0x36   : > { %s2175_s27 = scalar_lea.vmem %s368_s19, 2048  ;;  %p2183_p8 = scmp.lt.s32.totalorder %s368_s19, %s368_s19 }
  0x37   : > { %p2176_p9 = scmp.ne.s32.totalorder %s368_s19, %s2175_s27  ;;  %p2184_p3 = scmp.lt.s32.totalorder %s2175_s27, %s2175_s27 }
  0x39   : > { %p2178_p11 = pnand %p2176_p9, %p2580_p2  ;;  %p2185_p12 = por %p2184_p3, %p2183_p8 }
  0x3b   : > { %p2179_p13 = pneg %p2178_p11 }
  0x3d   : > { %p2186_p10 = pnand %p2185_p12, %p2179_p13 }
  0x3f   : > { %2189 = shalt.err (!%p2186_p10)
}
  0x40   : > { %s2412_s12 = smov 64   ;;  %s2413_s28 = smov 4  }
  0x41   : > { %1985 = dma.hbm_to_vmem [thread:$0]  (!%p2568_p0), %s2857_s4, 2048, %s368_s19, [#allocation9], %s2412_s12, %s2412_s12, %s2413_s28  }
  0x42   : > { %s2190_s16 = scalar_lea.hbm %s2817_s8, 2048 }
  0x43   : > { %p2191_p3 = scmp.ne.s32.totalorder %s2817_s8, %s2190_s16  ;;  %p2197_p12 = scmp.lt.u32.totalorder %s2190_s16, %s2817_s8 }
  0x45   : > { %p2193_p8 = pnand %p2191_p3, %p2580_p2 }
  0x47   : > { %p2194_p10 = pneg %p2193_p8 }
  0x49   : > { %p2199_p1 = pnand %p2197_p12, %p2194_p10 }
  0x4b   : > { %2202 = shalt.err (!%p2199_p1)
}
  0x4c   : > { %s2203_s21 = scalar_lea.vmem %s400_s20, 2048  ;;  %p2211_p7 = scmp.lt.s32.totalorder %s400_s20, %s400_s20 }
  0x4d   : > { %p2204_p4 = scmp.ne.s32.totalorder %s400_s20, %s2203_s21  ;;  %p2212_p9 = scmp.lt.s32.totalorder %s2203_s21, %s2203_s21 }
  0x4f   : > { %p2206_p5 = pnand %p2204_p4, %p2580_p2  ;;  %p2213_p11 = por %p2212_p9, %p2211_p7 }
  0x51   : > { %p2207_p6 = pneg %p2206_p5 }
  0x53   : > { %p2214_p13 = pnand %p2213_p11, %p2207_p6 }
  0x55   : > { %2217 = shalt.err (!%p2214_p13)
}
  0x56   : > { %1991 = dma.hbm_to_vmem [thread:$0]  (!%p2568_p0), %s2817_s8, 2048, %s400_s20, [#allocation12], %s2412_s12, %s2412_s12, %s2413_s28  }
  0x57   : > { %s2414_s17 = smov [#allocation5]   ;;  %s2415_s14 = smov [#allocation10]  }
  0x58   : > { %s351_s19 = sshll.u32 %s2414_s17, 4  ;;  %s383_s30 = sshll.u32 %s2415_s14, 4  ;;  %s352_s19 = int_to_ptr.vmem [resolvable:$true] %s351_s19  ;;  %s384_s30 = int_to_ptr.vmem [resolvable:$true] %s383_s30 }
  0x59   : > { %s2218_s27 = scalar_lea.hbm %s2811_s2, 2048 }
  0x5a   : > { %p2219_p3 = scmp.ne.s32.totalorder %s2811_s2, %s2218_s27  ;;  %p2225_p12 = scmp.lt.u32.totalorder %s2218_s27, %s2811_s2 }
  0x5c   : > { %p2221_p8 = pnand %p2219_p3, %p2580_p2 }
  0x5e   : > { %p2222_p10 = pneg %p2221_p8 }
  0x60   : > { %p2227_p1 = pnand %p2225_p12, %p2222_p10 }
  0x62   : > { %2230 = shalt.err (!%p2227_p1)
}
  0x63   : > { %s2231_s20 = scalar_lea.vmem %s352_s19, 2048  ;;  %p2239_p7 = scmp.lt.s32.totalorder %s352_s19, %s352_s19 }
  0x64   : > { %p2232_p4 = scmp.ne.s32.totalorder %s352_s19, %s2231_s20  ;;  %p2240_p9 = scmp.lt.s32.totalorder %s2231_s20, %s2231_s20 }
  0x66   : > { %p2234_p5 = pnand %p2232_p4, %p2580_p2  ;;  %p2241_p11 = por %p2240_p9, %p2239_p7 }
  0x68   : > { %p2235_p6 = pneg %p2234_p5 }
  0x6a   : > { %p2242_p13 = pnand %p2241_p11, %p2235_p6 }
  0x6c   : > { %2245 = shalt.err (!%p2242_p13)
}
  0x6d   : > { %1982 = dma.hbm_to_vmem [thread:$0]  (!%p2568_p0), %s2811_s2, 2048, %s352_s19, [#allocation6], %s2412_s12, %s2412_s12, %s2413_s28  }
  0x6e   : > { %s2246_s14 = scalar_lea.hbm %s2815_s6, 1024 }
  0x6f   : > { %p2247_p3 = scmp.ne.s32.totalorder %s2815_s6, %s2246_s14  ;;  %p2253_p12 = scmp.lt.u32.totalorder %s2246_s14, %s2815_s6 }
  0x71   : > { %p2249_p8 = pnand %p2247_p3, %p2580_p2 }
  0x73   : > { %p2250_p10 = pneg %p2249_p8 }
  0x75   : > { %p2255_p1 = pnand %p2253_p12, %p2250_p10 }
  0x77   : > { %2258 = shalt.err (!%p2255_p1)
}
  0x78   : > { %s2259_s11 = scalar_lea.vmem %s384_s30, 1024  ;;  %p2267_p7 = scmp.lt.s32.totalorder %s384_s30, %s384_s30 }
  0x79   : > { %p2260_p4 = scmp.ne.s32.totalorder %s384_s30, %s2259_s11  ;;  %p2268_p9 = scmp.lt.s32.totalorder %s2259_s11, %s2259_s11 }
  0x7b   : > { %p2262_p5 = pnand %p2260_p4, %p2580_p2  ;;  %p2269_p11 = por %p2268_p9, %p2267_p7 }
  0x7d   : > { %p2263_p6 = pneg %p2262_p5 }
  0x7f   : > { %p2270_p13 = pnand %p2269_p11, %p2263_p6 }
  0x81   : > { %2273 = shalt.err (!%p2270_p13)
}
  0x82   : > { %1988 = dma.hbm_to_vmem [thread:$0]  (!%p2568_p0), %s2815_s6, 1024, %s384_s30, [#allocation9], %s2412_s12, %s2412_s12, %s2413_s28  }
  0x83   : > { %s2416_s4 = smov [#allocation13]   ;;  %s2274_s14 = scalar_lea.hbm %s2819_s10, 2048 }
  0x84   : > { %s415_s9 = sshll.u32 %s2416_s4, 4  ;;  %p2275_p3 = scmp.ne.s32.totalorder %s2819_s10, %s2274_s14  ;;  %s416_s9 = int_to_ptr.vmem [resolvable:$true] %s415_s9 }
  0x85   : > { %p2281_p12 = scmp.lt.u32.totalorder %s2274_s14, %s2819_s10 }
  0x86   : > { %p2277_p8 = pnand %p2275_p3, %p2580_p2 }
  0x88   : > { %p2278_p10 = pneg %p2277_p8 }
  0x8a   : > { %p2283_p1 = pnand %p2281_p12, %p2278_p10 }
  0x8c   : > { %2286 = shalt.err (!%p2283_p1)
}
  0x8d   : > { %s2287_s30 = scalar_lea.vmem %s416_s9, 2048  ;;  %p2295_p7 = scmp.lt.s32.totalorder %s416_s9, %s416_s9 }
  0x8e   : > { %p2288_p4 = scmp.ne.s32.totalorder %s416_s9, %s2287_s30  ;;  %p2296_p9 = scmp.lt.s32.totalorder %s2287_s30, %s2287_s30 }
  0x90   : > { %p2290_p5 = pnand %p2288_p4, %p2580_p2  ;;  %p2297_p11 = por %p2296_p9, %p2295_p7 }
  0x92   : > { %p2291_p6 = pneg %p2290_p5 }
  0x94   : > { %p2298_p13 = pnand %p2297_p11, %p2291_p6 }
  0x96   : > { %2301 = shalt.err (!%p2298_p13)
}
  0x97   : > { %1994 = dma.hbm_to_vmem [thread:$0]  (!%p2568_p0), %s2819_s10, 2048, %s416_s9, [#allocation12], %s2412_s12, %s2412_s12, %s2413_s28  }
  0x98   : > { %p2859_p3 = scmp.ne.s32.totalorder %s2853_s13, 0 }
  0x99   : > { %p2860_p2 = scmp.ne.s32.totalorder (!%p2859_p3), %s2854_s26, 0 }
  0x9a   : > { %456 = sbr.rel (%p2859_p3) target bundleno = 1235 (0x4d3), region = 68 }
  0xa1   : > { %2363 = dma.done.wait (%p2860_p2), [#allocation6], 2048  }
  0xa2   : > { %2365 = vsyncadd (%p2860_p2), [#allocation6], 4294965248 }
  0xa3   : > { %2367 = dma.done.wait (%p2860_p2), [#allocation9], 3072  }
  0xa4   : > { %2369 = vsyncadd (%p2860_p2), [#allocation9], 4294964224 }
  0xa5   : > { %2371 = dma.done.wait (%p2860_p2), [#allocation12], 4096  }
  0xa6   : > { %2373 = vsyncadd (%p2860_p2), [#allocation12], 4294963200  ;;  %s522_s13 = sand.u32 1, %s2384_s22   ;;  %s2699_s18 = sshll.u32 %s2392_s24, 3  ;;  %v2083_v0 = vld [vmem:[#allocation5 + $0x40] sm:$0xff]   ;;  %v2085_v2 = vld [vmem:[#allocation5 + $0x48] sm:$0xff]  }
  0xa7   : > { %s2703_s15 = sshll.u32 %s522_s13, 2  ;;  %p525_p0 = scmp.lt.s32.totalorder %s2396_s25, 1  ;;  %v2084_v1 = vld [vmem:[#allocation5] sm:$0xff]   ;;  %1840 = vmatprep.subr.bf16.mxu0 %v2083_v0  ;;  %v2086_v3 = vld [vmem:[#allocation5 + $0x8] sm:$0xff]   ;;  %v2087_v4 = vld [vmem:[#allocation5 + $0x50] sm:$0xff]   ;;  %vm756_vm0 = vcmask 1042432  }
  0xa8   : > { %p527_p8 = scmp.lt.s32.totalorder %s2392_s24, 1  ;;  %1841 = vmatpush3.bf16.msra.mxu0 %v2084_v1  ;;  %v2088_v5 = vld [vmem:[#allocation5 + $0x10] sm:$0xff]   ;;  %v2089_v6 = vld [vmem:[#allocation5 + $0x58] sm:$0xff]   ;;  %v2091_v8 = vld [vmem:[#allocation5 + $0x60] sm:$0xff]   ;;  %vm757_vm1 = vsmask.f32 2304 }
  0xa9   : > { %s526_s12 = scalar_select %p525_p0, %s2396_s25, 1  ;;  %1842 = vmatprep.subr.bf16.mxu0 %v2085_v2  ;;  %v2090_v7 = vld [vmem:[#allocation5 + $0x18] sm:$0xff]   ;;  %v2092_v9 = vld [vmem:[#allocation5 + $0x20] sm:$0xff]   ;;  %v2093_v10 = vld [vmem:[#allocation5 + $0x68] sm:$0xff]  }
  0xaa   : > { %s528_s26 = scalar_select %p527_p8, %s2392_s24, 1  ;;  %v2094_v14 = vld [vmem:[#allocation5 + $0x28] sm:$0xff]   ;;  %v2095_v16 = vld [vmem:[#allocation5 + $0x70] sm:$0xff]   ;;  %v2097_v18 = vld [vmem:[#allocation5 + $0x78] sm:$0xff]  }
  0xab   : > { %s1728_s28 = sshll.u32 %s526_s12, 1  ;;  %v2096_v17 = vld [vmem:[#allocation5 + $0x30] sm:$0xff]   ;;  %v2098_v19 = vld [vmem:[#allocation5 + $0x38] sm:$0xff]   ;;  %v1734_v26 = vld [vmem:[%s2812_s3] ss:$0 sm:$0xff]  ;;  %s524_s30 = scalar_lea.vmem [#allocation14], %s2703_s15 }
  0xac   : > { %1843 = vmatpush3.bf16.msra.mxu0 %v2086_v3  ;;  %s530_s20 = sadd.s32 %s1728_s28, %s528_s26  ;;  %vm2718_vm2 = vmand %vm756_vm0, %vm757_vm1  ;;  %v759_v38 = vld [vmem:[#allocation3 + $0x4] sm:$0x7]  ;;  %p1753_p10 = scmp.ge.s32.totalorder %s2699_s18, 5 }
  0xad   : > { %1844 = vmatprep.subr.bf16.mxu0 %v2087_v4  ;;  %s1729_s4 = sshll.u32 %s530_s20, 2  ;;  %s1754_s11 = sadd.s32 (!%p1753_p10), 4294967291, %s2699_s18  ;;  %v767_v41 = vlaneseq (!%p1753_p10) }
  0xae   : > { %s532_s17 = scalar_lea.vmem %s2809_s0, %s1729_s4  ;;  %s540_s16 = scalar_lea.vmem %s2810_s1, %s1729_s4  ;;  %v769_v42 = vstv (!%p1753_p10), %s1754_s11 }
  0xaf   : > { %v543_v11 = vld [vmem:[%s532_s17] sm:$0x7]  ;;  %v768_v43 = vshrl.u32 (!%p1753_p10), %v767_v41, 7 }
  0xb0   : > { %1845 = vmatpush3.bf16.msra.mxu0 %v2088_v5  ;;  %v545_v12 = vld [vmem:[%s540_s16] sm:$0xf]  ;;  %544 = vst [vmem:[#allocation2] sm:$0x7] %v543_v11 }
  0xb1   : > { %1846 = vmatprep.subr.bf16.mxu0 %v2089_v6  ;;  %v547_v13 = vrot.slane %v545_v12, 5  ;;  %v770_v44 = vadd.s32 (!%p1753_p10), %v769_v42, %v768_v43 }
  0xb3   : > { %v548_v15 = vrot.slane %v547_v13, 4  ;;  %551 = vst [vmem:[#allocation2] sm:$0x8] %v547_v13  ;;  %vm772_vm3 = vcmp.ge.s32.totalorder (!%p1753_p10), %v770_v44, 0 }
  0xb4   : > { %1847 = vmatpush3.bf16.msra.mxu0 %v2090_v7  ;;  %vm775_vm4 = vmpackc.low (!%p1753_p10), %vm772_vm3, %vm772_vm3 }
  0xb5   : > { %1848 = vmatprep.subr.bf16.mxu0 %v2091_v8  ;;  %552 = vst [vmem:[#allocation2 + $0x4] sm:$0x7] %v548_v15 }
  0xb8   : > { %1849 = vmatpush3.bf16.msra.mxu0 %v2092_v9 }
  0xb9   : > { %1850 = vmatprep.subr.bf16.mxu0 %v2093_v10 }
  0xbc   : > { %1851 = vmatpush3.bf16.msra.mxu0 %v2094_v14  ;;  %v2099_v20 = vld [vmem:[#allocation2] sm:$0x7f]  }
  0xbd   : > { %1852 = vmatprep.subr.bf16.mxu0 %v2095_v16  ;;  %v562_v21 = vshrl.u32 %v2099_v20, 16  ;;  %v564_v22 = vshll.u32 %v2099_v20, 16 }
  0xbf   : > { %v566_v23 = vrot.slane %v564_v22, 1 }
  0xc0   : > { %1853 = vmatpush3.bf16.msra.mxu0 %v2096_v17 }
  0xc1   : > { %1854 = vmatprep.subr.bf16.mxu0 %v2097_v18  ;;  %v567_v24 = vor.u32 %v566_v23, %v562_v21 }
  0xc3   : > { %736 = vmatprep.mubr.bf16.mxu0 %v567_v24 }
  0xc4   : > { %1855 = vmatpush3.bf16.msra.mxu0 %v2098_v19 }
  0xc7   : > { %737 = vmatmul.mubr.bf16.vlgmr.msra.gmra.mrb[0].mxu0 %v2099_v20 }
 0x19a   : > { %v1856_v25 = vpop.f32.mrb[0].mxu0 }
 0x19b   : > { %v1857_v27 = vpop.f32.mrb[1].mxu0 }
 0x19c   : > { %v1858_v28 = vadd.f32 %v1857_v27, %v1856_v25  ;;  %v1859_v29 = vpop.f32.mrb[2].mxu0 }
 0x19d   : > { %v1860_v30 = vpop.f32.mrb[3].mxu0 }
 0x19e   : > { %v739_v31 = vadd.f32 %v1858_v28, %v1734_v26  ;;  %v1861_v32 = vadd.f32 %v1860_v30, %v1859_v29 }
 0x1a0   : > { %v745_v33 = vmax.f32 %v739_v31, 0.0  ;;  %v742_v34 = vadd.f32 %v1861_v32, %v1734_v26 }
 0x1a1   : > { %765 = sbr.rel (%p1753_p10) target bundleno = 431 (0x1af), region = 92 }
 0x1a2   : > { %v1834_v35 = vpack.c.bf16 %v745_v33, %v745_v33  ;;  %v746_v36 = vmax.f32 %v742_v34, 0.0 }
 0x1a4   : > { %755 = vst [vmem:[#allocation3] sm:$0xf] %v1834_v35  ;;  %v1835_v39 = vpack.c.bf16 %v746_v36, %v746_v36 }
 0x1a6   : > { %v760_v40 = vsel %vm2718_vm2, %v1835_v39, %v759_v38 }
 0x1a7   : > { %761 = vst [vmem:[#allocation3 + $0x4] sm:$0x7] %v760_v40 }
 0x1ab   : > { %v771_v45 = vld [vmem:[#allocation3] sm:$0x7] }
 0x1ac   : > { %v776_v46 = vsel %vm775_vm4, %v771_v45, 0 }
 0x1ad   : > { %v777_v47 = vsel %vm2718_vm2, %v776_v46, %v771_v45 }
 0x1ae   : > { %778 = vst [vmem:[#allocation3] sm:$0x7] %v777_v47 }
 0x1af PF: > { %v2100_v48 = vld [vmem:[#allocation8 + $0x40] sm:$0xff]   ;;  %v2417_v50 = vmov 0.0   ;;  %vm2418_vm5 = vmmov 0   ;;  %v2103_v52 = vld [vmem:[#allocation8 + $0x48] sm:$0xff]   ;;  %v2106_v55 = vld [vmem:[#allocation8 + $0x50] sm:$0xff]   ;;  %p1786_p12 = scmp.ge.s32.totalorder %s2699_s18, 4 }
 0x1b0   : > { %v2101_v49 = vld [vmem:[#allocation8] sm:$0xff]   ;;  %1937 = vmatprep.subr.bf16.mxu0 %v2417_v50  ;;  %1862 = vmatprep.subr.bf16.mxu1 %v2100_v48  ;;  %v2104_v53 = vld [vmem:[#allocation8 + $0x8] sm:$0xff]   ;;  %v2107_v56 = vld [vmem:[#allocation8 + $0x10] sm:$0xff]   ;;  %s1787_s20 = sadd.s32 (!%p1786_p12), 4294967292, %s2699_s18  ;;  %v1117_v44 = vlaneseq (!%p1786_p12) }
 0x1b1   : > { %v2102_v51 = vld [vmem:[#allocation10] sm:$0xff]   ;;  %1953 = vmatprep.mubr.msk.bf16.mxu0 %vm2418_vm5, %v2417_v50  ;;  %1863 = vmatpush3.bf16.msra.mxu1 %v2101_v49  ;;  %v2105_v54 = vld [vmem:[#allocation10 + $0x8] sm:$0xff]   ;;  %v2108_v57 = vld [vmem:[#allocation10 + $0x10] sm:$0xff]   ;;  %v1119_v45 = vstv (!%p1786_p12), %s1787_s20 }
 0x1b2   : > { %1938 = vmatpush3.bf16.msra.mxu0 %v2102_v51  ;;  %1864 = vmatprep.subr.bf16.mxu1 %v2103_v52  ;;  %v2109_v58 = vld [vmem:[#allocation8 + $0x58] sm:$0xff]   ;;  %v2112_v61 = vld [vmem:[#allocation8 + $0x60] sm:$0xff]   ;;  %v2115_v0 = vld [vmem:[#allocation8 + $0x68] sm:$0xff]   ;;  %v1118_v46 = vshrl.u32 (!%p1786_p12), %v1117_v44, 7 }
 0x1b3   : > { %1939 = vmatprep.subr.bf16.mxu0 %v2417_v50  ;;  %v2110_v59 = vld [vmem:[#allocation8 + $0x18] sm:$0xff]   ;;  %v2113_v62 = vld [vmem:[#allocation8 + $0x20] sm:$0xff]   ;;  %v2116_v1 = vld [vmem:[#allocation8 + $0x28] sm:$0xff]  }
 0x1b4   : > { %v2111_v60 = vld [vmem:[#allocation10 + $0x18] sm:$0xff]   ;;  %v2114_v63 = vld [vmem:[#allocation10 + $0x20] sm:$0xff]   ;;  %v2117_v2 = vld [vmem:[#allocation10 + $0x28] sm:$0xff]   ;;  %v1120_v47 = vadd.s32 (!%p1786_p12), %v1119_v45, %v1118_v46 }
 0x1b5   : > { %1865 = vmatpush3.bf16.msra.mxu1 %v2104_v53  ;;  %v2118_v3 = vld [vmem:[#allocation8 + $0x70] sm:$0xff]   ;;  %v2121_v8 = vld [vmem:[#allocation8 + $0x78] sm:$0xff]   ;;  %v2126_v14 = vld [vmem:[#allocation2] sm:$0x7e]  }
 0x1b6   : > { %1940 = vmatpush3.bf16.msra.mxu0 %v2105_v54  ;;  %1866 = vmatprep.subr.bf16.mxu1 %v2106_v55  ;;  %v2119_v4 = vld [vmem:[#allocation8 + $0x30] sm:$0xff]   ;;  %v2122_v12 = vld [vmem:[#allocation8 + $0x38] sm:$0xff]   ;;  %v1007_v19 = vrot.slane %v2126_v14, 1  ;;  %v1757_v21 = vld [vmem:[%s2814_s5] ss:$0 sm:$0xff]  ;;  %vm1122_vm6 = vcmp.ge.s32.totalorder (!%p1786_p12), %v1120_v47, 0 }
 0x1b7   : > { %1941 = vmatprep.subr.bf16.mxu0 %v2417_v50  ;;  %v779_v5 = vld [vmem:[#allocation3] sm:$0xf]  ;;  %v781_v6 = vld [vmem:[#allocation3 + $0x4] sm:$0x7]  ;;  %v2124_v16 = vld [vmem:[#allocation10 + $0x38] sm:$0xff]  }
 0x1b8   : > { %v2120_v7 = vld [vmem:[#allocation10 + $0x30] sm:$0xff]   ;;  %v1756_v9 = vcombine.low %v779_v5, %v781_v6  ;;  %v1774_v23 = vld [vmem:[%s2816_s7] ss:$0 sm:$0xff]  ;;  %vm1125_vm7 = vmpackc.low (!%p1786_p12), %vm1122_vm6, %vm1122_vm6 }
 0x1b9   : > { %1867 = vmatpush3.bf16.msra.mxu1 %v2107_v56  ;;  %v780_v13 = vld [vmem:[#allocation3 + $0x4] sm:$0x3] }
 0x1ba   : > { %1942 = vmatpush3.bf16.msra.mxu0 %v2108_v57  ;;  %1868 = vmatprep.subr.bf16.mxu1 %v2109_v58  ;;  %v792_v10 = vshrl.u32 %v1756_v9, 16  ;;  %v794_v11 = vshll.u32 %v1756_v9, 16  ;;  %v1755_v18 = vcombine.low %v779_v5, %v780_v13 }
 0x1bb   : > { %1943 = vmatprep.subr.bf16.mxu0 %v2417_v50 }
 0x1bc   : > { %v796_v15 = vrot.slane %v794_v11, 1 }
 0x1bd   : > { %1869 = vmatpush3.bf16.msra.mxu1 %v2110_v59 }
 0x1be   : > { %1944 = vmatpush3.bf16.msra.mxu0 %v2111_v60  ;;  %1870 = vmatprep.subr.bf16.mxu1 %v2112_v61  ;;  %v797_v17 = vor.u32 %v796_v15, %v792_v10 }
 0x1bf   : > { %1945 = vmatprep.subr.bf16.mxu0 %v2417_v50 }
 0x1c0   : > { %966 = vmatprep.mubr.bf16.mxu1 %v797_v17 }
 0x1c1   : > { %1871 = vmatpush3.bf16.msra.mxu1 %v2113_v62 }
 0x1c2   : > { %1946 = vmatpush3.bf16.msra.mxu0 %v2114_v63  ;;  %1872 = vmatprep.subr.bf16.mxu1 %v2115_v0 }
 0x1c3   : > { %1947 = vmatprep.subr.bf16.mxu0 %v2417_v50 }
 0x1c5   : > { %1873 = vmatpush3.bf16.msra.mxu1 %v2116_v1 }
 0x1c6   : > { %1948 = vmatpush3.bf16.msra.mxu0 %v2117_v2  ;;  %1874 = vmatprep.subr.bf16.mxu1 %v2118_v3 }
 0x1c7   : > { %1949 = vmatprep.subr.bf16.mxu0 %v2417_v50 }
 0x1c9   : > { %1875 = vmatpush3.bf16.msra.mxu1 %v2119_v4 }
 0x1ca   : > { %1950 = vmatpush3.bf16.msra.mxu0 %v2120_v7  ;;  %1876 = vmatprep.subr.bf16.mxu1 %v2121_v8 }
 0x1cb   : > { %1951 = vmatprep.subr.bf16.mxu0 %v2417_v50 }
 0x1cd   : > { %1877 = vmatpush3.bf16.msra.mxu1 %v2122_v12 }
 0x1ce   : > { %1952 = vmatpush3.bf16.msra.mxu0 %v2124_v16 }
 0x1d0   : > { %967 = vmatmul.mubr.bf16.vlgmr.msra.gmra.mrb[0].mxu1 %v1755_v18 }
 0x1d1   : > { %1954 = vmatmul.mubr.bf16.vlgmr.msra.gmra.mrb[4].mxu0 %v1007_v19 }
 0x2a3   : > { %v1878_v20 = vpop.f32.mrb[0].mxu1 }
 0x2a4   : > { %v1879_v22 = vpop.f32.mrb[1].mxu1  ;;  %v1091_v24 = vpop.f32.mrb[4].mxu0 }
 0x2a5   : > { %v1880_v25 = vadd.f32 %v1879_v22, %v1878_v20  ;;  %v1881_v26 = vpop.f32.mrb[2].mxu1  ;;  %v1955_v27 = vpop.f32.mrb[5].mxu0  ;;  %v1092_v31 = vadd.f32 %v1774_v23, %v1091_v24 }
 0x2a6   : > { %v1882_v28 = vpop.f32.mrb[3].mxu1  ;;  %v1094_v29 = vpop.f32.mrb[6].mxu0 }
 0x2a7   : > { %v969_v30 = vadd.f32 %v1880_v25, %v1757_v21  ;;  %v1883_v32 = vadd.f32 %v1882_v28, %v1881_v26  ;;  %v1956_v33 = vpop.f32.mrb[7].mxu0  ;;  %v1095_v38 = vadd.f32 %v1774_v23, %v1094_v29 }
 0x2a9   : > { %v975_v34 = vmax.f32 %v969_v30, 0.0  ;;  %v972_v35 = vadd.f32 %v1883_v32, %v1757_v21 }
 0x2ab   : > { %v1098_v36 = vadd.f32 %v1092_v31, %v975_v34  ;;  %v976_v37 = vmax.f32 %v972_v35, 0.0 }
 0x2ad   : > { %v1100_v39 = vmax.f32 %v1098_v36, 0.0  ;;  %v1099_v40 = vadd.f32 %v1095_v38, %v976_v37  ;;  %1115 = sbr.rel (%p1786_p12) target bundleno = 699 (0x2bb), region = 96 }
 0x2af   : > { %v1836_v41 = vpack.c.bf16 %v1100_v39, %v1100_v39  ;;  %v1101_v42 = vmax.f32 %v1099_v40, 0.0 }
 0x2b1   : > { %1110 = vst [vmem:[#allocation4] sm:$0xf] %v1836_v41  ;;  %v1837_v43 = vpack.c.bf16 %v1101_v42, %v1101_v42 }
 0x2b3   : > { %1111 = vst [vmem:[#allocation4 + $0x4] sm:$0x3] %v1837_v43 }
 0x2b8   : > { %v1121_v48 = vld [vmem:[#allocation4] sm:$0x3] }
 0x2b9   : > { %v1126_v49 = vsel %vm1125_vm7, %v1121_v48, 0 }
 0x2ba   : > { %1127 = vst [vmem:[#allocation4] sm:$0x3] %v1126_v49 }
 0x2bb PF: > { %v2127_v50 = vld [vmem:[#allocation11 + $0x40] sm:$0xff]   ;;  %v2129_v52 = vld [vmem:[#allocation11 + $0x48] sm:$0xff]   ;;  %v2131_v54 = vld [vmem:[#allocation11 + $0x50] sm:$0xff]   ;;  %s2863_s23 = sld [smem:[#allocation30_spill]]  ;;  %p1809_p1 = scmp.ge.s32.totalorder %s2699_s18, 2 }
 0x2bc   : > { %v2128_v51 = vld [vmem:[#allocation11] sm:$0xff]   ;;  %1893 = vmatprep.subr.bf16.mxu1 %v2127_v50  ;;  %v2130_v53 = vld [vmem:[#allocation11 + $0x8] sm:$0xff]   ;;  %v2132_v55 = vld [vmem:[#allocation11 + $0x10] sm:$0xff]   ;;  %s1810_s17 = sadd.s32 (!%p1809_p1), 4294967294, %s2699_s18  ;;  %v1338_v18 = vlaneseq (!%p1809_p1) }
 0x2bd   : > { %1894 = vmatpush3.bf16.msra.mxu1 %v2128_v51  ;;  %v2133_v56 = vld [vmem:[#allocation11 + $0x58] sm:$0xff]   ;;  %v2135_v58 = vld [vmem:[#allocation11 + $0x60] sm:$0xff]   ;;  %v2137_v60 = vld [vmem:[#allocation11 + $0x68] sm:$0xff]   ;;  %v1340_v19 = vstv (!%p1809_p1), %s1810_s17 }
 0x2be   : > { %1895 = vmatprep.subr.bf16.mxu1 %v2129_v52  ;;  %v2134_v57 = vld [vmem:[#allocation11 + $0x18] sm:$0xff]   ;;  %v2136_v59 = vld [vmem:[#allocation11 + $0x20] sm:$0xff]   ;;  %v2138_v63 = vld [vmem:[#allocation11 + $0x28] sm:$0xff]   ;;  %v1339_v20 = vshrl.u32 (!%p1809_p1), %v1338_v18, 7 }
 0x2bf   : > { %v2139_v0 = vld [vmem:[#allocation11 + $0x70] sm:$0xff]   ;;  %v2141_v2 = vld [vmem:[#allocation11 + $0x78] sm:$0xff]  }
 0x2c0   : > { %v2140_v1 = vld [vmem:[#allocation11 + $0x30] sm:$0xff]   ;;  %v2142_v3 = vld [vmem:[#allocation11 + $0x38] sm:$0xff]   ;;  %v1341_v21 = vadd.s32 (!%p1809_p1), %v1340_v19, %v1339_v20 }
 0x2c1   : > { %1896 = vmatpush3.bf16.msra.mxu1 %v2130_v53  ;;  %v2143_v61 = vld [vmem:[#allocation4] sm:$0x3e]   ;;  %v1790_v6 = vld [vmem:[%s2863_s23] ss:$0 sm:$0xff] }
 0x2c2   : > { %1897 = vmatprep.subr.bf16.mxu1 %v2131_v54  ;;  %v1143_v62 = vrot.slane %v2143_v61, 1  ;;  %v2144_v4 = vld [vmem:[#allocation4] sm:$0x1f]   ;;  %vm1343_vm8 = vcmp.ge.s32.totalorder (!%p1809_p1), %v1341_v21, 0 }
 0x2c3   : > { %vm1346_vm9 = vmpackc.low (!%p1809_p1), %vm1343_vm8, %vm1343_vm8 }
 0x2c4   : > { %1312 = vmatprep.mubr.bf16.mxu1 %v1143_v62 }
 0x2c5   : > { %1898 = vmatpush3.bf16.msra.mxu1 %v2132_v55 }
 0x2c6   : > { %1899 = vmatprep.subr.bf16.mxu1 %v2133_v56 }
 0x2c9   : > { %1900 = vmatpush3.bf16.msra.mxu1 %v2134_v57 }
 0x2ca   : > { %1901 = vmatprep.subr.bf16.mxu1 %v2135_v58 }
 0x2cd   : > { %1902 = vmatpush3.bf16.msra.mxu1 %v2136_v59 }
 0x2ce   : > { %1903 = vmatprep.subr.bf16.mxu1 %v2137_v60 }
 0x2d1   : > { %1904 = vmatpush3.bf16.msra.mxu1 %v2138_v63 }
 0x2d2   : > { %1905 = vmatprep.subr.bf16.mxu1 %v2139_v0 }
 0x2d5   : > { %1906 = vmatpush3.bf16.msra.mxu1 %v2140_v1 }
 0x2d6   : > { %1907 = vmatprep.subr.bf16.mxu1 %v2141_v2 }
 0x2d9   : > { %1908 = vmatpush3.bf16.msra.mxu1 %v2142_v3 }
 0x2dc   : > { %1313 = vmatmul.mubr.bf16.vlgmr.msra.gmra.mrb[4].mxu1 %v2144_v4 }
 0x3af   : > { %v1909_v5 = vpop.f32.mrb[4].mxu1 }
 0x3b0   : > { %v1910_v7 = vpop.f32.mrb[5].mxu1 }
 0x3b1   : > { %v1911_v8 = vadd.f32 %v1910_v7, %v1909_v5  ;;  %v1912_v9 = vpop.f32.mrb[6].mxu1 }
 0x3b2   : > { %v1913_v10 = vpop.f32.mrb[7].mxu1 }
 0x3b3   : > { %v1315_v11 = vadd.f32 %v1911_v8, %v1790_v6  ;;  %v1914_v12 = vadd.f32 %v1913_v10, %v1912_v9 }
 0x3b5   : > { %v1321_v13 = vmax.f32 %v1315_v11, 0.0  ;;  %v1318_v14 = vadd.f32 %v1914_v12, %v1790_v6  ;;  %1336 = sbr.rel (%p1809_p1) target bundleno = 963 (0x3c3), region = 100 }
 0x3b7   : > { %v1838_v15 = vpack.c.bf16 %v1321_v13, %v1321_v13  ;;  %v1322_v16 = vmax.f32 %v1318_v14, 0.0 }
 0x3b9   : > { %1331 = vst [vmem:[#allocation2] sm:$0xf] %v1838_v15  ;;  %v1839_v17 = vpack.c.bf16 %v1322_v16, %v1322_v16 }
 0x3bb   : > { %1332 = vst [vmem:[#allocation2 + $0x4] sm:$0x1] %v1839_v17 }
 0x3c0   : > { %v1342_v22 = vld [vmem:[#allocation2] sm:$0x1] }
 0x3c1   : > { %v1347_v23 = vsel %vm1346_vm9, %v1342_v22, 0 }
 0x3c2   : > { %1348 = vst [vmem:[#allocation2] sm:$0x1] %v1347_v23 }
 0x3c3 PF: > { %v2145_v24 = vld [vmem:[#allocation13 + $0x40] sm:$0xff]   ;;  %v2147_v26 = vld [vmem:[#allocation13 + $0x48] sm:$0xff]   ;;  %v2149_v28 = vld [vmem:[#allocation13 + $0x50] sm:$0xff]   ;;  %s2864_s29 = sld [smem:[#allocation31_spill]]  ;;  %vm1541_vm10 = vcmask 1043456   ;;  %s1830_s16 = sshll.u32 %s2396_s25, 1 }
 0x3c4   : > { %v2146_v25 = vld [vmem:[#allocation13] sm:$0xff]   ;;  %1915 = vmatprep.subr.bf16.mxu0 %v2145_v24  ;;  %v2148_v27 = vld [vmem:[#allocation13 + $0x8] sm:$0xff]   ;;  %v2150_v29 = vld [vmem:[#allocation13 + $0x10] sm:$0xff]   ;;  %s2865_s27 = sld [smem:[#allocation25_spill]]  ;;  %s1562_s21 = sadd.s32 %s2392_s24, %s1830_s16 }
 0x3c5   : > { %1916 = vmatpush3.bf16.msra.mxu0 %v2146_v25  ;;  %v2151_v30 = vld [vmem:[#allocation13 + $0x58] sm:$0xff]   ;;  %v2153_v32 = vld [vmem:[#allocation13 + $0x60] sm:$0xff]   ;;  %v2155_v34 = vld [vmem:[#allocation13 + $0x68] sm:$0xff]   ;;  %s1831_s11 = sshll.u32 %s1562_s21, 6  ;;  %s1566_s19 = sshll.u32 %s524_s30, 4  ;;  %s2754_s19 = int_to_ptr.vmem [resolvable:$true] %s1566_s19 }
 0x3c6   : > { %1917 = vmatprep.subr.bf16.mxu0 %v2147_v26  ;;  %v2152_v31 = vld [vmem:[#allocation13 + $0x18] sm:$0xff]   ;;  %v2154_v33 = vld [vmem:[#allocation13 + $0x20] sm:$0xff]   ;;  %v2156_v37 = vld [vmem:[#allocation13 + $0x28] sm:$0xff]   ;;  %s2866_s28 = sld [smem:[#allocation32_spill]]  ;;  %s1551_s24 = scalar_lea.sflag [#allocation7], %s522_s13 }
 0x3c7   : > { %v2157_v38 = vld [vmem:[#allocation13 + $0x70] sm:$0xff]   ;;  %v2159_v40 = vld [vmem:[#allocation13 + $0x78] sm:$0xff]   ;;  %s2302_s25 = scalar_lea.vmem %s2754_s19, 64  ;;  %s2419_s9 = smov [#allocation14]  }
 0x3c8   : > { %v2158_v39 = vld [vmem:[#allocation13 + $0x30] sm:$0xff]   ;;  %v2160_v41 = vld [vmem:[#allocation13 + $0x38] sm:$0xff]   ;;  %p2303_p4 = scmp.ne.s32.totalorder %s2754_s19, %s2302_s25  ;;  %s2306_s23 = sshll.u32 %s2419_s9, 4  ;;  %s2307_s23 = int_to_ptr.vmem [resolvable:$false] %s2306_s23 }
 0x3c9   : > { %1918 = vmatpush3.bf16.msra.mxu0 %v2148_v27  ;;  %v2161_v35 = vld [vmem:[#allocation2] sm:$0x1e]   ;;  %v1535_v43 = vld [vmem:[#allocation4] sm:$0xc]  ;;  %v1536_v44 = vld [vmem:[#allocation4 + $0x4] sm:$0x3]  ;;  %p2309_p9 = scmp.lt.s32.totalorder %s2754_s19, %s2307_s23 }
 0x3ca   : > { %1919 = vmatprep.subr.bf16.mxu0 %v2149_v28  ;;  %v1357_v36 = vrot.slane %v2161_v35, 1  ;;  %v1349_v42 = vld [vmem:[#allocation2] sm:$0xf]  ;;  %v1537_v45 = vunpack.c.l.bf16 %v1535_v43  ;;  %v1538_v46 = vunpack.c.l.bf16 %v1536_v44  ;;  %p2868_p5 = scmp.ne.s32.totalorder %s2865_s27, 0  ;;  %s2308_s17 = scalar_lea.vmem %s2307_s23, 128 }
 0x3cb   : > { %v1812_v48 = vld [vmem:[%s2864_s29] ss:$0 sm:$0xff]  ;;  %p2310_p11 = scmp.lt.s32.totalorder %s2308_s17, %s2302_s25 }
 0x3cc   : > { %1526 = vmatprep.mubr.bf16.mxu0 %v1357_v36  ;;  %v1542_v50 = vrot.slane %v1537_v45, 4  ;;  %v1543_v51 = vrot.slane %v1538_v46, 4  ;;  %s2867_s20 = smov %s2866_s28  ;;  %s2752_s4 = scalar_lea.hbm %s2866_s28, %s1831_s11 }
 0x3cd   : > { %1920 = vmatpush3.bf16.msra.mxu0 %v2150_v29  ;;  %p2304_p6 = pnand %p2303_p4, %p2868_p5  ;;  %p2311_p13 = por %p2310_p11, %p2309_p9 }
 0x3ce   : > { %1921 = vmatprep.subr.bf16.mxu0 %v2151_v30  ;;  %v1544_v56 = vsel %vm1541_vm10, %v1542_v50, %v1543_v51 }
 0x3cf   : > { %p2305_p7 = pneg %p2304_p6 }
 0x3d1   : > { %1922 = vmatpush3.bf16.msra.mxu0 %v2152_v31  ;;  %p2312_p3 = pnand %p2311_p13, %p2305_p7 }
 0x3d2   : > { %1923 = vmatprep.subr.bf16.mxu0 %v2153_v32 }
 0x3d5   : > { %1924 = vmatpush3.bf16.msra.mxu0 %v2154_v33 }
 0x3d6   : > { %1925 = vmatprep.subr.bf16.mxu0 %v2155_v34 }
 0x3d9   : > { %1926 = vmatpush3.bf16.msra.mxu0 %v2156_v37 }
 0x3da   : > { %1927 = vmatprep.subr.bf16.mxu0 %v2157_v38 }
 0x3dd   : > { %1928 = vmatpush3.bf16.msra.mxu0 %v2158_v39 }
 0x3de   : > { %1929 = vmatprep.subr.bf16.mxu0 %v2159_v40 }
 0x3e1   : > { %1930 = vmatpush3.bf16.msra.mxu0 %v2160_v41 }
 0x3e4   : > { %1527 = vmatmul.mubr.bf16.vlgmr.msra.gmra.mrb[8].mxu0 %v1349_v42 }
 0x4b7   : > { %v1931_v47 = vpop.f32.mrb[8].mxu0 }
 0x4b8   : > { %v1932_v49 = vpop.f32.mrb[9].mxu0 }
 0x4b9   : > { %v1933_v52 = vadd.f32 %v1932_v49, %v1931_v47  ;;  %v1934_v53 = vpop.f32.mrb[10].mxu0 }
 0x4ba   : > { %v1935_v54 = vpop.f32.mrb[11].mxu0 }
 0x4bb   : > { %v1529_v55 = vadd.f32 %v1933_v52, %v1812_v48 }
 0x4bd   : > { %v1534_v57 = vmax.f32 %v1529_v55, 0.0 }
 0x4bf   : > { %v1546_v58 = vadd.f32 %v1544_v56, %v1534_v57 }
 0x4c1   : > { %v1547_v59 = vmax.f32 %v1546_v58, 0.0 }
 0x4c3   : > { %v1548_v60 = vpack.c.bf16 %v1547_v59, %v1547_v59 }
 0x4c5   : > { %1549 = vst [vmem:[%s524_s30] sm:$0xf] %v1548_v60 }
 0x4c6   : > { %2315 = shalt.err (!%p2312_p3)
}
 0x4c7   : > { %s2316_s13 = scalar_lea.hbm %s2752_s4, 64  ;;  %s2320_s18 = scalar_lea.hbm %s2867_s20, 256 }
 0x4c8   : > { %p2317_p2 = scmp.ne.s32.totalorder %s2752_s4, %s2316_s13  ;;  %p2321_p10 = scmp.lt.u32.totalorder %s2752_s4, %s2867_s20 }
 0x4c9   : > { %p2322_p12 = scmp.lt.u32.totalorder %s2320_s18, %s2316_s13  ;;  %p2324_p4 = scmp.lt.u32.totalorder %s2316_s13, %s2752_s4 }
 0x4ca   : > { %p2318_p0 = pnand %p2317_p2, %p2868_p5 }
 0x4cb   : > { %p2323_p1 = por %p2322_p12, %p2321_p10 }
 0x4cc   : > { %p2319_p8 = pneg %p2318_p0 }
 0x4cd   : > { %p2325_p6 = por %p2324_p4, %p2323_p1 }
 0x4cf   : > { %p2326_p7 = pnand %p2325_p6, %p2319_p8 }
 0x4d1   : > { %2329 = shalt.err (!%p2326_p7)
}
 0x4d2   : > { %1977 = dma.vmem_to_hbm [thread:$0]  (%p2868_p5), %s2754_s19, 64, %s2752_s4, %s1551_s24  }
 0x4d3 PF: > { %s2869_s16 = sld [smem:[#allocation23_spill]]  ;;  %s2870_s21 = sld [smem:[#allocation19_spill]] }
 0x4d4   : > { %s2871_s11 = sld [smem:[#allocation27_spill]] }
 0x4d9   : > { %p2009_p9 = scmp.ge.s32.totalorder %s2869_s16, 2  ;;  %s1578_s12 = sand.u32 1, %s2870_s21  }
 0x4da   : > { %p2872_p11 = scmp.ne.s32.totalorder %s2871_s11, 0  ;;  %s1579_s26 = scalar_lea.sflag [#allocation7], %s1578_s12 }
 0x4dc   : > { %p1996_p13 = pnand %p2009_p9, %p2872_p11 }
 0x4de   : > { %2375 = dma.done.wait (!%p1996_p13), %s1579_s26, 64  }
 0x4df   : > { %2377 = vsyncadd (!%p1996_p13), %s1579_s26, 4294967232  ;;  %s28_s28 = sadd.s32 1, %s2869_s16   ;;  %s2873_s25 = sld [smem:[#allocation20_spill]] }
 0x4e0   : > { %p25_p3 = scmp.ge.s32.totalorder %s28_s28, 6   ;;  %s2874_s23 = sld [smem:[#allocation28_spill]] }
 0x4e1   : > { %s2875_s24 = sld [smem:[#allocation21_spill]]  ;;  %s2876_s27 = sld [smem:[#allocation22_spill]] }
 0x4e2   : > { %s2877_s26 = sld [smem:[#allocation24_spill]]  ;;  %s2878_s19 = sld [smem:[#allocation26_spill]] }
 0x4e3   : > { %s2879_s21 = smov %s2384_s22  ;;  %27 = sbr.rel (!%p25_p3) target bundleno = 13 (0xd), region = 139 }
 0x4e5   : > { %s2880_s22 = smov %s2873_s25 }
 0x4e7   : > { %s2881_s25 = smov %s2876_s27 }
 0x4e8   : > { %s2882_s27 = smov %s2878_s19 }
 0x4ea   :  { %1584 = vsyncpa [#allocation6], 1 }
 0x4eb   :  { %1586 = vsyncpa [#allocation6 + $0x1], 1 }
 0x4ec   :  { %1587 = vsyncpa [#allocation9], 1 }
 0x4ed   :  { %1588 = vsyncpa [#allocation12], 1 }
 0x4ee   :  { %1589 = vsyncpa [#allocation7], 1 }
 0x4ef   :  { %1591 = vsyncpa [#allocation7 + $0x1], 1 }

</bundles_post_ra>
